<compile_context>
chip_gen: v6e
topology: v6e:2x2x1
jax: 0.10.0
libtpu: 0.0.40
codegen_flags: <defaults>
</compile_context>

<pallas_src>
import functools

import jax
import jax.numpy as jnp
from jax.experimental import pallas as pl
from jax.experimental.pallas import tpu as pltpu


# ----------------------------------------------------------------------------
# Single-pass kernel: one grid step == one batch sample; both modalities gated
# in the same step (read once, write once => ~2x tensor bytes of HBM traffic).
# ----------------------------------------------------------------------------
def _mmtm_fused_kernel(vis_ref, sk_ref,
                       wsq_v_ref, wsq_s_ref, bsq_ref,
                       wv_ref, bv_ref, ws_ref, bs_ref,
                       outv_ref, outs_ref):
    x_v = vis_ref[0]          # (Cv, Sv), native dtype
    x_s = sk_ref[0]           # (Cs, Ss), native dtype

    # Squeeze: per-channel means as MXU ones-matmuls. f32 accumulation via
    # preferred_element_type without materializing an f32 copy of the tile;
    # keeps VPU/XLU free for the gating multiply.
    ones_v = jnp.ones((x_v.shape[-1], 1), x_v.dtype)
    ones_s = jnp.ones((x_s.shape[-1], 1), x_s.dtype)
    mean_v = jnp.dot(x_v, ones_v,
                     preferred_element_type=jnp.float32) * (1.0 / x_v.shape[-1])   # (Cv,1)
    mean_s = jnp.dot(x_s, ones_s,
                     preferred_element_type=jnp.float32) * (1.0 / x_s.shape[-1])   # (Cs,1)

    # fc_squeeze(concat([mean_v, mean_s])) as a split matmul (no in-kernel
    # concat); column-vector form uses the nn.Linear (out, in) layout as-is.
    exc = (jnp.dot(wsq_v_ref[...], mean_v, preferred_element_type=jnp.float32)
           + jnp.dot(wsq_s_ref[...], mean_s, preferred_element_type=jnp.float32)
           + bsq_ref[...])                                   # (dim_out, 1)
    exc = jnp.maximum(exc, 0.0)

    gate_v = jax.nn.sigmoid(
        jnp.dot(wv_ref[...], exc, preferred_element_type=jnp.float32) + bv_ref[...])  # (Cv,1)
    gate_s = jax.nn.sigmoid(
        jnp.dot(ws_ref[...], exc, preferred_element_type=jnp.float32) + bs_ref[...])  # (Cs,1)

    # Channel-wise gating in the native input dtype (no f32 tile temporaries).
    # Re-read the refs so the compiler can stream load -> multiply -> store.
    outv_ref[0] = vis_ref[0] * gate_v.astype(outv_ref.dtype)
    outs_ref[0] = sk_ref[0] * gate_s.astype(outs_ref.dtype)


# ----------------------------------------------------------------------------
# Two-pass fallback kernels (per-sample block does not fit VMEM, e.g. v7x).
# ----------------------------------------------------------------------------
def _channel_sum_kernel(x_ref, sum_ref, *, s_total, s_tile):
    """Accumulates per-channel sums over S chunks into an (1, C, 1) f32 output."""
    j = pl.program_id(1)

    @pl.when(j == 0)
    def _():
        sum_ref[...] = jnp.zeros_like(sum_ref)

    x = x_ref[0]                                              # (C, s_tile)
    if s_total % s_tile:
        # Ragged last chunk: the padded part of the input block is undefined,
        # zero it before the reduction.
        col = jax.lax.broadcasted_iota(jnp.int32, x.shape, 1) + j * s_tile
        x = jnp.where(col < s_total, x, jnp.zeros_like(x))
    ones = jnp.ones((x.shape[-1], 1), x.dtype)
    sum_ref[...] += jnp.dot(x, ones, preferred_element_type=jnp.float32)[None]


def _gating_kernel(x_ref, g_ref, o_ref):
    # x: (1, C, s_tile); g: (1, C, 1) already in x's dtype.
    o_ref[0] = x_ref[0] * g_ref[0]


# ----------------------------------------------------------------------------
# Wrapper helpers
# ----------------------------------------------------------------------------
def _vmem_capacity_bytes():
    try:
        return int(pltpu.get_tpu_info().vmem_capacity_bytes)
    except Exception:
        return 64 << 20          # conservative default (v7x per-TensorCore VMEM)


def _resolve_s_tile(C, S, itemsize, override=None, target_bytes=2 << 20):
    """Pick an S tile: a multiple of 128, or the full S when it is small."""
    ts = override
    if ts is None:
        ts = max(128, (target_bytes // max(C * itemsize, 1)) // 128 * 128)
    return int(S) if ts >= S else int(ts)


def _channel_sums(x_flat, s_tile, budget):
    """(N, C, S) -> (N, C, 1) f32 per-channel sums, S-tiled."""
    N, C, S = x_flat.shape
    itemsize = jnp.dtype(x_flat.dtype).itemsize
    vmem_limit = int(max(16 << 20, min(budget, 8 * C * s_tile * itemsize + (4 << 20))))
    kernel = functools.partial(_channel_sum_kernel, s_total=S, s_tile=s_tile)
    return pl.pallas_call(
        kernel,
        out_shape=jax.ShapeDtypeStruct((N, C, 1), jnp.float32),
        grid=(N, pl.cdiv(S, s_tile)),
        in_specs=[pl.BlockSpec((1, C, s_tile), lambda i, j: (i, 0, j))],
        out_specs=pl.BlockSpec((1, C, 1), lambda i, j: (i, 0, 0)),
        compiler_params=pltpu.CompilerParams(
            dimension_semantics=("parallel", "arbitrary"),
            vmem_limit_bytes=vmem_limit),
    )(x_flat)


def _apply_gate(x_flat, gate, s_tile, budget):
    """(N, C, S) * (N, C, 1) -> (N, C, S), S-tiled, both grid axes parallel."""
    N, C, S = x_flat.shape
    itemsize = jnp.dtype(x_flat.dtype).itemsize
    vmem_limit = int(max(16 << 20, min(budget, 10 * C * s_tile * itemsize + (4 << 20))))
    return pl.pallas_call(
        _gating_kernel,
        out_shape=jax.ShapeDtypeStruct(x_flat.shape, x_flat.dtype),
        grid=(N, pl.cdiv(S, s_tile)),
        in_specs=[pl.BlockSpec((1, C, s_tile), lambda i, j: (i, 0, j)),
                  pl.BlockSpec((1, C, 1), lambda i, j: (i, 0, 0))],
        out_specs=pl.BlockSpec((1, C, s_tile), lambda i, j: (i, 0, j)),
        input_output_aliases={0: 0},
        compiler_params=pltpu.CompilerParams(
            dimension_semantics=("parallel", "parallel"),
            vmem_limit_bytes=vmem_limit),
    )(x_flat, gate)


# ----------------------------------------------------------------------------
# Public forward
# ----------------------------------------------------------------------------
def mmtm_forward(visual, skeleton, params, *, force_two_pass=False, s_tile=None):
    """visual: (N, Cv, H, W); skeleton: (N, Cs, T, V). Returns gated tensors."""
    N, Cv = visual.shape[:2]
    Cs = skeleton.shape[1]
    # Native-dtype HBM I/O, no wrapper-side upcast (the op is HBM bound).
    vis_flat = visual.reshape(N, Cv, -1)
    sk_flat = skeleton.reshape(N, Cs, -1)
    Sv = vis_flat.shape[-1]
    Ss = sk_flat.shape[-1]
    iv = jnp.dtype(vis_flat.dtype).itemsize
    isk = jnp.dtype(sk_flat.dtype).itemsize

    # Hoist weight casts out of the kernel (tiny, resident VMEM blocks).
    wsq_v, wsq_s, bsq, wv, bv, ws, bs = [jnp.asarray(p, jnp.float32) for p in params]
    weights = (wsq_v, wsq_s, bsq, wv, bv, ws, bs)
    weight_bytes = sum(int(w.size) * 4 for w in weights)
    dim_out = bsq.shape[0]

    # Generation-aware VMEM budget (v5e/v6e: 128 MiB, v7x: 64 MiB per TC).
    vmem_cap = _vmem_capacity_bytes()
    budget = max(16 << 20, vmem_cap - (8 << 20))

    # Single-pass needs in+out per-sample blocks for both modalities, double
    # buffered; gating runs in native dtype so there are no f32 tile temps.
    sample_bytes = Cv * Sv * iv + Cs * Ss * isk
    need = 4 * sample_bytes + 2 * weight_bytes + (2 << 20)
    use_single_pass = (not force_two_pass) and (need <= budget)

    if use_single_pass:
        sample_v_spec = pl.BlockSpec((1, Cv, Sv), lambda i: (i, 0, 0))
        sample_s_spec = pl.BlockSpec((1, Cs, Ss), lambda i: (i, 0, 0))

        def full_block(arr):
            return pl.BlockSpec(arr.shape, lambda i, nd=arr.ndim: (0,) * nd)

        in_specs = [sample_v_spec, sample_s_spec] + [full_block(w) for w in weights]

        bytes_accessed = 2 * (int(vis_flat.size) * iv + int(sk_flat.size) * isk) + weight_bytes
        flops = (3 * N * (Cv * Sv + Cs * Ss)            # ones-matmul means + gating mul
                 + 4 * N * dim_out * (Cv + Cs))         # squeeze + excitation matmuls
        cost = pl.CostEstimate(flops=int(flops),
                               transcendentals=int(N * (Cv + Cs)),
                               bytes_accessed=int(bytes_accessed))

        out_v, out_s = pl.pallas_call(
            _mmtm_fused_kernel,
            out_shape=(jax.ShapeDtypeStruct(vis_flat.shape, vis_flat.dtype),
                       jax.ShapeDtypeStruct(sk_flat.shape, sk_flat.dtype)),
            grid=(N,),
            in_specs=in_specs,
            out_specs=(sample_v_spec, sample_s_spec),
            # Outputs have identical shape/dtype to the flattened inputs:
            # alias them to halve peak HBM footprint for this op.
            input_output_aliases={0: 0, 1: 1},
            compiler_params=pltpu.CompilerParams(
                dimension_semantics=("parallel",),   # batch axis -> megacore on v7x
                vmem_limit_bytes=int(max(16 << 20, min(need + (2 << 20), budget)))),
            cost_estimate=cost,
        )(vis_flat, sk_flat, *weights)
        return out_v.reshape(visual.shape), out_s.reshape(skeleton.shape)

    # ---- Two-pass fallback: per-sample block too big for VMEM --------------
    ts_v = _resolve_s_tile(Cv, Sv, iv, s_tile)
    ts_s = _resolve_s_tile(Cs, Ss, isk, s_tile)

    # Pass 1: S-tiled per-channel sums (MXU), reduction axis last/arbitrary.
    sums_v = _channel_sums(vis_flat, ts_v, budget)      # (N, Cv, 1) f32
    sums_s = _channel_sums(sk_flat, ts_s, budget)       # (N, Cs, 1) f32

    # Tiny FC / sigmoid stage on (N, C): negligible work, plain JAX.
    mean_v = sums_v[:, :, 0] * (1.0 / Sv)
    mean_s = sums_s[:, :, 0] * (1.0 / Ss)
    exc = jnp.maximum(mean_v @ wsq_v.T + mean_s @ wsq_s.T + bsq[:, 0], 0.0)
    gate_v = jax.nn.sigmoid(exc @ wv.T + bv[:, 0]).astype(vis_flat.dtype)[:, :, None]
    gate_s = jax.nn.sigmoid(exc @ ws.T + bs[:, 0]).astype(sk_flat.dtype)[:, :, None]

    # Pass 2: S-tiled elementwise gating, both grid axes parallel (megacore).
    out_v = _apply_gate(vis_flat, gate_v, ts_v, budget)
    out_s = _apply_gate(sk_flat, gate_s, ts_s, budget)
    return out_v.reshape(visual.shape), out_s.reshape(skeleton.shape)


# ----------------------------------------------------------------------------
# Params / reference (PyTorch nn.Linear layout: weight is (out, in))
# ----------------------------------------------------------------------------
def make_mmtm_params(key, dim_visual, dim_skeleton, ratio):
    dim = dim_visual + dim_skeleton
    dim_out = int(2 * dim / ratio)
    ks = jax.random.split(key, 6)
    wsq = jax.random.normal(ks[0], (dim_out, dim), jnp.float32) * 0.1
    bsq = jax.random.normal(ks[1], (dim_out, 1), jnp.float32) * 0.1
    wv = jax.random.normal(ks[2], (dim_visual, dim_out), jnp.float32) * 0.1
    bv = jax.random.normal(ks[3], (dim_visual, 1), jnp.float32) * 0.1
    ws = jax.random.normal(ks[4], (dim_skeleton, dim_out), jnp.float32) * 0.1
    bs = jax.random.normal(ks[5], (dim_skeleton, 1), jnp.float32) * 0.1
    # Split fc_squeeze weight by input modality (concat -> split matmul).
    wsq_v = wsq[:, :dim_visual]        # (dim_out, Cv)
    wsq_s = wsq[:, dim_visual:]        # (dim_out, Cs)
    return (wsq_v, wsq_s, bsq, wv, bv, ws, bs)


def mmtm_reference(visual, skeleton, params):
    """Pure-JAX reference reproducing the PyTorch forward exactly."""
    wsq_v, wsq_s, bsq, wv, bv, ws, bs = params
    N, Cv = visual.shape[:2]
    Cs = skeleton.shape[1]
    mv = jnp.mean(visual.reshape(N, Cv, -1).astype(jnp.float32), axis=-1)
    ms = jnp.mean(skeleton.reshape(N, Cs, -1).astype(jnp.float32), axis=-1)
    exc = jnp.maximum(mv @ wsq_v.T + ms @ wsq_s.T + bsq[:, 0], 0.0)
    gv = jax.nn.sigmoid(exc @ wv.T + bv[:, 0])
    gs = jax.nn.sigmoid(exc @ ws.T + bs[:, 0])
    return visual * gv[:, :, None, None], skeleton * gs[:, :, None, None]


if __name__ == "__main__":
    key = jax.random.PRNGKey(0)
    k_vis, k_sk, k_par, k_vis2, k_sk2 = jax.random.split(key, 5)

    # Small shapes consistent with the module: visual NCHW, skeleton NCTV.
    N, dim_visual, dim_skeleton, ratio = 2, 4, 4, 2
    visual = jax.random.normal(k_vis, (N, dim_visual, 16, 16), jnp.float32)
    skeleton = jax.random.normal(k_sk, (N, dim_skeleton, 8, 16), jnp.float32)
    params = make_mmtm_params(k_par, dim_visual, dim_skeleton, ratio)

    # Single-pass (fused) path.
    ref_v, ref_s = mmtm_reference(visual, skeleton, params)
    out_v, out_s = mmtm_forward(visual, skeleton, params)
    jax.block_until_ready((out_v, out_s))
    assert out_v.shape == visual.shape and out_s.shape == skeleton.shape
    assert jnp.allclose(out_v, ref_v, atol=1e-4, rtol=1e-4)
    assert jnp.allclose(out_s, ref_s, atol=1e-4, rtol=1e-4)

    # Exercise the two-pass (S-tiled) fallback path, including ragged S chunks.
    visual2 = jax.random.normal(k_vis2, (N, dim_visual, 16, 13), jnp.float32)    # S=208
    skeleton2 = jax.random.normal(k_sk2, (N, dim_skeleton, 10, 15), jnp.float32)  # S=150
    ref_v2, ref_s2 = mmtm_reference(visual2, skeleton2, params)
    out_v2, out_s2 = mmtm_forward(visual2, skeleton2, params,
                                  force_two_pass=True, s_tile=128)
    jax.block_until_ready((out_v2, out_s2))
    assert jnp.allclose(out_v2, ref_v2, atol=1e-4, rtol=1e-4)
    assert jnp.allclose(out_s2, ref_s2, atol=1e-4, rtol=1e-4)

    print("KERNEL_OK")
</pallas_src>

<mosaic_0001>
module attributes {stable_mosaic.version = 11 : i64} {
  func.func @_mmtm_fused_kernel(%arg0: i32, %arg1: memref<1x4x256xf32, #tpu.memory_space<vmem>>, %arg2: memref<1x4x128xf32, #tpu.memory_space<vmem>>, %arg3: memref<8x4xf32, #tpu.memory_space<vmem>>, %arg4: memref<8x4xf32, #tpu.memory_space<vmem>>, %arg5: memref<8x1xf32, #tpu.memory_space<vmem>>, %arg6: memref<4x8xf32, #tpu.memory_space<vmem>>, %arg7: memref<4x1xf32, #tpu.memory_space<vmem>>, %arg8: memref<4x8xf32, #tpu.memory_space<vmem>>, %arg9: memref<4x1xf32, #tpu.memory_space<vmem>>, %arg10: memref<1x4x256xf32, #tpu.memory_space<vmem>>, %arg11: memref<1x4x128xf32, #tpu.memory_space<vmem>>) attributes {dimension_semantics = [#tpu.dimension_semantics<parallel>], iteration_bounds = array<i64: 2>, scalar_prefetch = 0 : i64, scratch_operands = 0 : i64, tpu.core_type = #tpu.core_type<tc>, window_params = [{transform_indices = @transform_0, window_bounds = array<i64: 1, 4, 256>}, {transform_indices = @transform_1, window_bounds = array<i64: 1, 4, 128>}, {pipeline_mode = #tpu.pipeline_mode<synchronous>, transform_indices = @transform_2, window_bounds = array<i64: 8, 4>}, {pipeline_mode = #tpu.pipeline_mode<synchronous>, transform_indices = @transform_3, window_bounds = array<i64: 8, 4>}, {pipeline_mode = #tpu.pipeline_mode<synchronous>, transform_indices = @transform_4, window_bounds = array<i64: 8, 1>}, {pipeline_mode = #tpu.pipeline_mode<synchronous>, transform_indices = @transform_5, window_bounds = array<i64: 4, 8>}, {pipeline_mode = #tpu.pipeline_mode<synchronous>, transform_indices = @transform_6, window_bounds = array<i64: 4, 1>}, {pipeline_mode = #tpu.pipeline_mode<synchronous>, transform_indices = @transform_7, window_bounds = array<i64: 4, 8>}, {pipeline_mode = #tpu.pipeline_mode<synchronous>, transform_indices = @transform_8, window_bounds = array<i64: 4, 1>}, {transform_indices = @transform_9, window_bounds = array<i64: 1, 4, 256>}, {transform_indices = @transform_10, window_bounds = array<i64: 1, 4, 128>}]} {
    %c0 = arith.constant 0 : index
    %c0_0 = arith.constant 0 : index
    %c0_1 = arith.constant 0 : index
    %0 = vector.load %arg1[%c0, %c0_0, %c0_1] : memref<1x4x256xf32, #tpu.memory_space<vmem>>, vector<1x4x256xf32>
    %1 = vector.shape_cast %0 : vector<1x4x256xf32> to vector<4x256xf32>
    %c0_2 = arith.constant 0 : index
    %c0_3 = arith.constant 0 : index
    %c0_4 = arith.constant 0 : index
    %2 = vector.load %arg2[%c0_2, %c0_3, %c0_4] : memref<1x4x128xf32, #tpu.memory_space<vmem>>, vector<1x4x128xf32>
    %3 = vector.shape_cast %2 : vector<1x4x128xf32> to vector<4x128xf32>
    %cst = arith.constant 1.000000e+00 : f32
    %4 = vector.broadcast %cst : f32 to vector<256x1xf32>
    %cst_5 = arith.constant 1.000000e+00 : f32
    %5 = vector.broadcast %cst_5 : f32 to vector<128x1xf32>
    %cst_6 = arith.constant dense<0.000000e+00> : vector<4x1xf32>
    %6 = tpu.matmul %1, %4, %cst_6 {dimension_numbers = #tpu.dot_dimension_numbers<[1], [0], [0], [1], [0, 0, 1, 1], [], []>} : vector<4x256xf32>, vector<256x1xf32>, vector<4x1xf32> -> vector<4x1xf32>
    %cst_7 = arith.constant 3.906250e-03 : f32
    %7 = vector.broadcast %cst_7 : f32 to vector<4x1xf32>
    %8 = arith.mulf %6, %7 : vector<4x1xf32>
    %cst_8 = arith.constant dense<0.000000e+00> : vector<4x1xf32>
    %9 = tpu.matmul %3, %5, %cst_8 {dimension_numbers = #tpu.dot_dimension_numbers<[1], [0], [0], [1], [0, 0, 1, 1], [], []>} : vector<4x128xf32>, vector<128x1xf32>, vector<4x1xf32> -> vector<4x1xf32>
    %cst_9 = arith.constant 7.812500e-03 : f32
    %10 = vector.broadcast %cst_9 : f32 to vector<4x1xf32>
    %11 = arith.mulf %9, %10 : vector<4x1xf32>
    %c0_10 = arith.constant 0 : index
    %c0_11 = arith.constant 0 : index
    %12 = vector.load %arg3[%c0_10, %c0_11] : memref<8x4xf32, #tpu.memory_space<vmem>>, vector<8x4xf32>
    %cst_12 = arith.constant dense<0.000000e+00> : vector<8x1xf32>
    %13 = tpu.matmul %12, %8, %cst_12 {dimension_numbers = #tpu.dot_dimension_numbers<[1], [0], [0], [1], [0, 0, 1, 1], [], []>} : vector<8x4xf32>, vector<4x1xf32>, vector<8x1xf32> -> vector<8x1xf32>
    %c0_13 = arith.constant 0 : index
    %c0_14 = arith.constant 0 : index
    %14 = vector.load %arg4[%c0_13, %c0_14] : memref<8x4xf32, #tpu.memory_space<vmem>>, vector<8x4xf32>
    %cst_15 = arith.constant dense<0.000000e+00> : vector<8x1xf32>
    %15 = tpu.matmul %14, %11, %cst_15 {dimension_numbers = #tpu.dot_dimension_numbers<[1], [0], [0], [1], [0, 0, 1, 1], [], []>} : vector<8x4xf32>, vector<4x1xf32>, vector<8x1xf32> -> vector<8x1xf32>
    %16 = arith.addf %13, %15 : vector<8x1xf32>
    %c0_16 = arith.constant 0 : index
    %c0_17 = arith.constant 0 : index
    %17 = vector.load %arg5[%c0_16, %c0_17] : memref<8x1xf32, #tpu.memory_space<vmem>>, vector<8x1xf32>
    %18 = arith.addf %16, %17 : vector<8x1xf32>
    %cst_18 = arith.constant 0.000000e+00 : f32
    %19 = vector.broadcast %cst_18 : f32 to vector<8x1xf32>
    %20 = arith.maximumf %18, %19 : vector<8x1xf32>
    %c0_19 = arith.constant 0 : index
    %c0_20 = arith.constant 0 : index
    %21 = vector.load %arg6[%c0_19, %c0_20] : memref<4x8xf32, #tpu.memory_space<vmem>>, vector<4x8xf32>
    %cst_21 = arith.constant dense<0.000000e+00> : vector<4x1xf32>
    %22 = tpu.matmul %21, %20, %cst_21 {dimension_numbers = #tpu.dot_dimension_numbers<[1], [0], [0], [1], [0, 0, 1, 1], [], []>} : vector<4x8xf32>, vector<8x1xf32>, vector<4x1xf32> -> vector<4x1xf32>
    %c0_22 = arith.constant 0 : index
    %c0_23 = arith.constant 0 : index
    %23 = vector.load %arg7[%c0_22, %c0_23] : memref<4x1xf32, #tpu.memory_space<vmem>>, vector<4x1xf32>
    %24 = arith.addf %22, %23 : vector<4x1xf32>
    %25 = arith.negf %24 : vector<4x1xf32>
    %26 = math.exp %25 : vector<4x1xf32>
    %cst_24 = arith.constant 1.000000e+00 : f32
    %27 = vector.broadcast %cst_24 : f32 to vector<4x1xf32>
    %28 = arith.addf %27, %26 : vector<4x1xf32>
    %29 = arith.divf %27, %28 : vector<4x1xf32>
    %c0_25 = arith.constant 0 : index
    %c0_26 = arith.constant 0 : index
    %30 = vector.load %arg8[%c0_25, %c0_26] : memref<4x8xf32, #tpu.memory_space<vmem>>, vector<4x8xf32>
    %cst_27 = arith.constant dense<0.000000e+00> : vector<4x1xf32>
    %31 = tpu.matmul %30, %20, %cst_27 {dimension_numbers = #tpu.dot_dimension_numbers<[1], [0], [0], [1], [0, 0, 1, 1], [], []>} : vector<4x8xf32>, vector<8x1xf32>, vector<4x1xf32> -> vector<4x1xf32>
    %c0_28 = arith.constant 0 : index
    %c0_29 = arith.constant 0 : index
    %32 = vector.load %arg9[%c0_28, %c0_29] : memref<4x1xf32, #tpu.memory_space<vmem>>, vector<4x1xf32>
    %33 = arith.addf %31, %32 : vector<4x1xf32>
    %34 = arith.negf %33 : vector<4x1xf32>
    %35 = math.exp %34 : vector<4x1xf32>
    %cst_30 = arith.constant 1.000000e+00 : f32
    %36 = vector.broadcast %cst_30 : f32 to vector<4x1xf32>
    %37 = arith.addf %36, %35 : vector<4x1xf32>
    %38 = arith.divf %36, %37 : vector<4x1xf32>
    %c0_31 = arith.constant 0 : index
    %c0_32 = arith.constant 0 : index
    %c0_33 = arith.constant 0 : index
    %39 = vector.load %arg1[%c0_31, %c0_32, %c0_33] : memref<1x4x256xf32, #tpu.memory_space<vmem>>, vector<1x4x256xf32>
    %40 = vector.shape_cast %39 : vector<1x4x256xf32> to vector<4x256xf32>
    %41 = vector.broadcast %29 : vector<4x1xf32> to vector<4x256xf32>
    %42 = arith.mulf %40, %41 : vector<4x256xf32>
    %c0_34 = arith.constant 0 : index
    %c0_35 = arith.constant 0 : index
    %c0_36 = arith.constant 0 : index
    %43 = vector.load %arg10[%c0_34, %c0_35, %c0_36] : memref<1x4x256xf32, #tpu.memory_space<vmem>>, vector<1x4x256xf32>
    %44 = vector.shape_cast %43 : vector<1x4x256xf32> to vector<4x256xf32>
    %45 = vector.shape_cast %42 : vector<4x256xf32> to vector<1x4x256xf32>
    tpu.vector_store %arg10[%c0_34, %c0_35, %c0_36], %45 {strides = array<i32>} : memref<1x4x256xf32, #tpu.memory_space<vmem>>, vector<1x4x256xf32>,
    %c0_37 = arith.constant 0 : index
    %c0_38 = arith.constant 0 : index
    %c0_39 = arith.constant 0 : index
    %46 = vector.load %arg2[%c0_37, %c0_38, %c0_39] : memref<1x4x128xf32, #tpu.memory_space<vmem>>, vector<1x4x128xf32>
    %47 = vector.shape_cast %46 : vector<1x4x128xf32> to vector<4x128xf32>
    %48 = vector.broadcast %38 : vector<4x1xf32> to vector<4x128xf32>
    %49 = arith.mulf %47, %48 : vector<4x128xf32>
    %c0_40 = arith.constant 0 : index
    %c0_41 = arith.constant 0 : index
    %c0_42 = arith.constant 0 : index
    %50 = vector.load %arg11[%c0_40, %c0_41, %c0_42] : memref<1x4x128xf32, #tpu.memory_space<vmem>>, vector<1x4x128xf32>
    %51 = vector.shape_cast %50 : vector<1x4x128xf32> to vector<4x128xf32>
    %52 = vector.shape_cast %49 : vector<4x128xf32> to vector<1x4x128xf32>
    tpu.vector_store %arg11[%c0_40, %c0_41, %c0_42], %52 {strides = array<i32>} : memref<1x4x128xf32, #tpu.memory_space<vmem>>, vector<1x4x128xf32>,
    return
  }
  func.func @transform_0(%arg0: i32) -> (i32, i32, i32) {
    %c0_i32 = arith.constant 0 : i32
    %c0_i32_0 = arith.constant 0 : i32
    %c0_i32_1 = arith.constant 0 : i32
    return %arg0, %c0_i32, %c0_i32_0 : i32, i32, i32
  }
  func.func @transform_1(%arg0: i32) -> (i32, i32, i32) {
    %c0_i32 = arith.constant 0 : i32
    %c0_i32_0 = arith.constant 0 : i32
    %c0_i32_1 = arith.constant 0 : i32
    return %arg0, %c0_i32, %c0_i32_0 : i32, i32, i32
  }
  func.func @transform_2(%arg0: i32) -> (i32, i32) {
    %c0_i32 = arith.constant 0 : i32
    %c0_i32_0 = arith.constant 0 : i32
    %c0_i32_1 = arith.constant 0 : i32
    return %c0_i32, %c0_i32_0 : i32, i32
  }
  func.func @transform_3(%arg0: i32) -> (i32, i32) {
    %c0_i32 = arith.constant 0 : i32
    %c0_i32_0 = arith.constant 0 : i32
    %c0_i32_1 = arith.constant 0 : i32
    return %c0_i32, %c0_i32_0 : i32, i32
  }
  func.func @transform_4(%arg0: i32) -> (i32, i32) {
    %c0_i32 = arith.constant 0 : i32
    %c0_i32_0 = arith.constant 0 : i32
    %c0_i32_1 = arith.constant 0 : i32
    return %c0_i32, %c0_i32_0 : i32, i32
  }
  func.func @transform_5(%arg0: i32) -> (i32, i32) {
    %c0_i32 = arith.constant 0 : i32
    %c0_i32_0 = arith.constant 0 : i32
    %c0_i32_1 = arith.constant 0 : i32
    return %c0_i32, %c0_i32_0 : i32, i32
  }
  func.func @transform_6(%arg0: i32) -> (i32, i32) {
    %c0_i32 = arith.constant 0 : i32
    %c0_i32_0 = arith.constant 0 : i32
    %c0_i32_1 = arith.constant 0 : i32
    return %c0_i32, %c0_i32_0 : i32, i32
  }
  func.func @transform_7(%arg0: i32) -> (i32, i32) {
    %c0_i32 = arith.constant 0 : i32
    %c0_i32_0 = arith.constant 0 : i32
    %c0_i32_1 = arith.constant 0 : i32
    return %c0_i32, %c0_i32_0 : i32, i32
  }
  func.func @transform_8(%arg0: i32) -> (i32, i32) {
    %c0_i32 = arith.constant 0 : i32
    %c0_i32_0 = arith.constant 0 : i32
    %c0_i32_1 = arith.constant 0 : i32
    return %c0_i32, %c0_i32_0 : i32, i32
  }
  func.func @transform_9(%arg0: i32) -> (i32, i32, i32) {
    %c0_i32 = arith.constant 0 : i32
    %c0_i32_0 = arith.constant 0 : i32
    %c0_i32_1 = arith.constant 0 : i32
    return %arg0, %c0_i32, %c0_i32_0 : i32, i32, i32
  }
  func.func @transform_10(%arg0: i32) -> (i32, i32, i32) {
    %c0_i32 = arith.constant 0 : i32
    %c0_i32_0 = arith.constant 0 : i32
    %c0_i32_1 = arith.constant 0 : i32
    return %arg0, %c0_i32, %c0_i32_0 : i32, i32, i32
  }
}

</mosaic_0001>

<bundles_post_ra>
// kernel: tpu_custom_call.1
= control target key start
LH: loop header
LB: loop body
LE: loop exit
PB: predicated region body
PF: predicated region fallthrough
CT: control target
= control target key end

     0   :  { %s1863_s0 = inlined_call_operand.hbm [shape: f32[2,4,256], index: 0, kind: input, shape index: {}, may-alias: {0,9}]   ;;  %s1864_s1 = inlined_call_operand.hbm [shape: f32[2,4,128], index: 1, kind: input, shape index: {}, may-alias: {1,10}]   ;;  %s1865_s2 = inlined_call_operand.vmem [shape: f32[8,4], index: 2, kind: input, shape index: {}]   ;;  %s1866_s3 = inlined_call_operand.vmem [shape: f32[8,4], index: 3, kind: input, shape index: {}]   ;;  %s1867_s4 = inlined_call_operand.vmem [shape: f32[8,1], index: 4, kind: input, shape index: {}]   ;;  %s1868_s5 = inlined_call_operand.vmem [shape: f32[4,8], index: 5, kind: input, shape index: {}]   ;;  %s1869_s6 = inlined_call_operand.vmem [shape: f32[4,1], index: 6, kind: input, shape index: {}]   ;;  %s1870_s7 = inlined_call_operand.vmem [shape: f32[4,8], index: 7, kind: input, shape index: {}]   ;;  %s1871_s8 = inlined_call_operand.vmem [shape: f32[4,1], index: 8, kind: input, shape index: {}]   ;;  %s1872_s9 = inlined_call_operand.hbm [shape: f32[2,4,256], index: 9, kind: output, shape index: {0}, may-alias: {0,9}]   ;;  %s1873_s10 = inlined_call_operand.hbm [shape: f32[2,4,128], index: 10, kind: output, shape index: {1}, may-alias: {1,10}]  }
   0x1   :  { %1880 = sst [smem:[#allocation18_spill]] %s1863_s0 }
   0x2   :  { %16 = vsyncpa [#allocation3], 0 }
   0x3   :  { %18 = vsyncpa [#allocation3 + $0x1], 0 }
   0x4   :  { %19 = vsyncpa [#allocation6], 0 }
   0x5   :  { %21 = vsyncpa [#allocation6 + $0x1], 0 }
   0x6   :  { %22 = vsyncpa [#allocation4], 0 }
   0x7   :  { %24 = vsyncpa [#allocation4 + $0x1], 0 }
   0x8   :  { %25 = vsyncpa [#allocation9], 0 }
   0x9   :  { %27 = vsyncpa [#allocation9 + $0x1], 0  ;;  %s1509_s13 = smov 0   ;;  %s1511_s14 = smov 0  }
   0xa   :  { %s1513_s15 = smov 0   ;;  %s1515_s16 = smov 0  }
   0xb LB: > { %1881 = sst [smem:[#allocation14_spill]] %s1439_s15  ;;  %s1530_s17 = sadd.s32 4294967295, %s1443_s16   ;;  %s1443_s16 = sphi %s1515_s16, %s1900_s16   ;;  %s1439_s15 = sphi %s1513_s15, %s1902_s15   ;;  %s1435_s14 = sphi %s1511_s14, %s1904_s14   ;;  %s1431_s13 = sphi %s1509_s13, %s1903_s13  }
   0xc   : > { %1882 = sst [smem:[#allocation15_spill]] %s1443_s16  ;;  %s1073_s18 = sadd.s32 4294967294, %s1443_s16  }
   0xd   : > { %s1534_s19 = sadd.s32 1, %s1443_s16   ;;  %s40_s20 = sadd.s32 1, %s1439_s15 }
   0xe   : > { %1883 = sst [smem:[#allocation16_spill]] %s1534_s19  ;;  %s37_s21 = ssub.s32 %s1443_s16, %s1534_s19 }
   0xf   : > { %p47_p0 = scmp.ne.s32.totalorder %s1439_s15, %s1435_s14  ;;  %p38_p1 = scmp.eq.s32.totalorder %s37_s21, 0 }
  0x10   : > { %p48_p2 = scmp.eq.s32.totalorder %s1443_s16, 0  ;;  %p53_p3 = scmp.ne.s32.totalorder %s1435_s14, %s1431_s13 }
  0x11   : > { %p54_p4 = scmp.eq.s32.totalorder %s1530_s17, 0  ;;  %p250_p7 = scmp.eq.s32.totalorder %s1530_s17, 1 }
  0x12   : > { %s1546_s22 = scalar_select %p38_p1, %s1439_s15, %s40_s20  }
  0x13   : > { %p1548_p5 = por %p48_p2, %p47_p0  ;;  %p1552_p6 = por %p54_p4, %p53_p3 }
  0x14   : > { %1884 = sst [smem:[#allocation17_spill]] %s1546_s22  ;;  %p256_p8 = scmp.eq.s32.totalorder %s1073_s18, 1 }
  0x15   : > { %s1886_s24 = scalar_select %p1552_p6, 1, 0 }
  0x16   : > { %p1240_p10 = scmp.lt.s32.totalorder %s1443_s16, 2  ;;  %p1559_p11 = por %p250_p7, %p47_p0 }
  0x17   : > { %p1563_p12 = por %p256_p8, %p53_p3  ;;  %s1568_s27 = sand.u32 1, %s1439_s15  }
  0x18   : > { %s1887_s25 = scalar_select %p1559_p11, 1, 0 }
  0x19   : > { %s1888_s26 = scalar_select %p1563_p12, 1, 0 }
  0x1a   : > { %s1101_s28 = sshll.u32 %s1443_s16, 7  ;;  %s1076_s29 = sshll.u32 %s1568_s27, 3 }
  0x1b   : > { %s1889_s0 = sld [smem:[#allocation18_spill]]  ;;  %s327_s18 = scalar_lea.vmem [#allocation2], %s1076_s29 }
  0x1c   : > { %s335_s20 = sshll.u32 %s327_s18, 4  ;;  %p1579_p13 = pnand %p1240_p10, %p1548_p5  ;;  %s1583_s20 = int_to_ptr.vmem [resolvable:$true] %s335_s20 }
  0x1d   : > { %s324_s22 = scalar_lea.sflag [#allocation3], %s1568_s27 }
  0x1e   : > { %p1291_p3 = pneg %p1579_p13 }
  0x21   : > { %s1575_s12 = scalar_lea.hbm %s1889_s0, %s1101_s28  ;;  %s1294_s29 = scalar_lea.hbm %s1889_s0, 256 }
  0x22   : > { %s1289_s30 = scalar_lea.hbm %s1575_s12, 128  ;;  %p1295_p5 = scmp.lt.s32.totalorder %s1575_s12, %s1889_s0 }
  0x23   : > { %p1290_p2 = scmp.ne.s32.totalorder %s1575_s12, %s1289_s30  ;;  %p1296_p8 = scmp.lt.s32.totalorder %s1294_s29, %s1289_s30 }
  0x25   : > { %p1292_p4 = pnand %p1291_p3, %p1290_p2  ;;  %p1297_p10 = por %p1296_p8, %p1295_p5 }
  0x27   : > { %p1293_p7 = pneg %p1292_p4 }
  0x29   : > { %p1298_p9 = pnand %p1297_p10, %p1293_p7 }
  0x2b   : > { %1301 = shalt.err (!%p1298_p9)
}
  0x2c   : > { %s1302_s15 = scalar_lea.vmem %s1583_s20, 128  ;;  %s1445_s23 = smov [#allocation2]  }
  0x2d   : > { %p1303_p0 = scmp.ne.s32.totalorder %s1583_s20, %s1302_s15  ;;  %s1307_s28 = sshll.u32 %s1445_s23, 4  ;;  %s1308_s28 = int_to_ptr.vmem [resolvable:$false] %s1307_s28 }
  0x2e   : > { %s1309_s19 = scalar_lea.vmem %s1308_s28, 256  ;;  %p1310_p1 = scmp.lt.s32.totalorder %s1583_s20, %s1308_s28 }
  0x2f   : > { %p1305_p2 = pnand %p1303_p0, %p1291_p3  ;;  %p1311_p12 = scmp.lt.s32.totalorder %s1309_s19, %s1302_s15 }
  0x31   : > { %p1306_p4 = pneg %p1305_p2  ;;  %p1312_p11 = por %p1311_p12, %p1310_p1 }
  0x33   : > { %p1313_p5 = pnand %p1312_p11, %p1306_p4 }
  0x35   : > { %1316 = shalt.err (!%p1313_p5)
}
  0x36   : > { %1229 = dma.hbm_to_vmem [thread:$0]  (!%p1579_p13), %s1575_s12, 128, %s1583_s20, %s324_s22  }
  0x37   : > { %p1891_p9 = scmp.lt.s32.totalorder %s1443_s16, 3  ;;  %p1892_p0 = scmp.ge.s32.totalorder %s1443_s16, 1 }
  0x38   : > { %s1079_s15 = sshll.u32 %s1568_s27, 2  ;;  %s1080_s19 = sshll.u32 %s1443_s16, 6 }
  0x39   : > { %p1616_p7 = pnand %p1892_p0, %p1891_p9  ;;  %s1625_s18 = scalar_lea.hbm %s1864_s1, %s1080_s19 }
  0x3a   : > { %s346_s23 = scalar_lea.vmem [#allocation5], %s1079_s15  ;;  %s343_s22 = scalar_lea.sflag [#allocation6], %s1568_s27 }
  0x3b   : > { %s1893_s30 = scalar_select %p1616_p7, 1, 0 }
  0x3c   : > { %s353_s28 = sshll.u32 %s346_s23, 4  ;;  %s1317_s12 = scalar_lea.hbm %s1625_s18, 64  ;;  %s354_s28 = int_to_ptr.vmem [resolvable:$true] %s353_s28 }
  0x3d   : > { %p1318_p11 = scmp.ne.s32.totalorder %s1625_s18, %s1317_s12  ;;  %s1322_s16 = scalar_lea.hbm %s1864_s1, 128 }
  0x3e   : > { %p1323_p8 = scmp.lt.s32.totalorder %s1625_s18, %s1864_s1  ;;  %p1324_p10 = scmp.lt.s32.totalorder %s1322_s16, %s1317_s12 }
  0x3f   : > { %p1320_p12 = pnand %p1318_p11, %p1291_p3 }
  0x40   : > { %p1325_p2 = por %p1324_p10, %p1323_p8 }
  0x41   : > { %p1321_p1 = pneg %p1320_p12 }
  0x43   : > { %p1326_p4 = pnand %p1325_p2, %p1321_p1 }
  0x45   : > { %1329 = shalt.err (!%p1326_p4)
}
  0x46   : > { %s1330_s15 = scalar_lea.vmem %s354_s28, 64  ;;  %s1446_s27 = smov [#allocation5]  }
  0x47   : > { %p1331_p5 = scmp.ne.s32.totalorder %s354_s28, %s1330_s15  ;;  %s1335_s11 = sshll.u32 %s1446_s27, 4  ;;  %s1336_s11 = int_to_ptr.vmem [resolvable:$false] %s1335_s11 }
  0x48   : > { %s1337_s0 = scalar_lea.vmem %s1336_s11, 128  ;;  %p1338_p11 = scmp.lt.s32.totalorder %s354_s28, %s1336_s11 }
  0x49   : > { %p1333_p9 = pnand %p1331_p5, %p1291_p3  ;;  %p1339_p12 = scmp.lt.s32.totalorder %s1337_s0, %s1330_s15 }
  0x4b   : > { %p1334_p0 = pneg %p1333_p9  ;;  %p1340_p6 = por %p1339_p12, %p1338_p11 }
  0x4d   : > { %p1341_p7 = pnand %p1340_p6, %p1334_p0 }
  0x4f   : > { %1344 = shalt.err (!%p1341_p7)
}
  0x50   : > { %1232 = dma.hbm_to_vmem [thread:$0]  (!%p1579_p13), %s1625_s18, 64, %s354_s28, %s343_s22  }
  0x51   : > { %p1894_p1 = scmp.ne.s32.totalorder %s1893_s30, 0 }
  0x52   : > { %s1649_s16 = sand.u32 (!%p1894_p1), 1, %s1435_s14   ;;  %p1895_p6 = scmp.ne.s32.totalorder (!%p1894_p1), %s1886_s24, 0 }
  0x53   : > { %362 = sbr.rel (%p1894_p1) target bundleno = 915 (0x393), region = 56  ;;  %s1082_s23 = sshll.u32 (!%p1894_p1), %s1649_s16, 3 }
  0x54   : > { %s365_s12 = scalar_lea.sflag (!%p1894_p1), [#allocation3], %s1649_s16  ;;  %s1655_s20 = scalar_lea.vmem (!%p1894_p1), [#allocation2], %s1082_s23 }
  0x58   : > { %1414 = dma.done.wait (%p1895_p6), %s365_s12, 128  }
  0x59   : > { %1416 = vsyncadd (%p1895_p6), %s365_s12, 4294967168  ;;  %s1083_s21 = sshll.u32 %s1649_s16, 2  ;;  %s374_s30 = scalar_lea.sflag [#allocation6], %s1649_s16 }
  0x5a   : > { %s1665_s18 = scalar_lea.vmem [#allocation5], %s1083_s21 }
  0x5b   : > { %1418 = dma.done.wait (%p1895_p6), %s374_s30, 64  }
  0x5c   : > { %1420 = vsyncadd (%p1895_p6), %s374_s30, 4294967232  ;;  %v1447_v0 = vmov 1.0   ;;  %v1448_v1 = vmov 0.0   ;;  %v1718_v2 = vld [vmem:[%s1655_s20] sm:$0xff]  ;;  %v425_v4 = vld [vmem:[%s1665_s18] sm:$0xf]  ;;  %v900_v43 = vlaneseq }
  0x5d   : > { %1103 = vmatprep.subr.mxu0 %v1447_v0  ;;  %1163 = vmatprep.subr.mxu1 %v1448_v1  ;;  %v427_v3 = vcombine.high %v1718_v2, %v1718_v2  ;;  %vm1449_vm0 = vmmov 0   ;;  %vm577_vm1 = vcmask 1043456   ;;  %v572_v10 = vld [vmem:[%s1866_s3] sm:$0xff]  ;;  %vm573_vm2 = vcmask 31744   ;;  %s1102_s22 = sshll.u32 %s1530_s17, 7  ;;  %s416_s29 = scalar_lea.vmem [#allocation7], %s1082_s23 }
  0x5e   : > { %1104 = vmatpush3.msra.mxu0 %v1447_v0  ;;  %1164 = vmatpush3.msra.mxu1 %v1447_v0  ;;  %v571_v13 = vld [vmem:[%s1865_s2] sm:$0xff]  ;;  %vm732_vm3 = vcmask 64512   ;;  %v1450_v24 = vmov 0   ;;  %v1451_v41 = vmov 839922192   ;;  %v901_v45 = vshrl.u32 %v900_v43, 7  ;;  %s1791_s20 = scalar_lea.hbm %s1872_s9, %s1102_s22 }
  0x5f   : > { %1105 = vmatprep.subr.mxu0 %v1447_v0  ;;  %1165 = vmatprep.subr.mxu1 %v1448_v1  ;;  %v727_v17 = vld [vmem:[%s1867_s4] sm:$0xff]  ;;  %v898_v42 = vunpack.c.l.s4 %v1451_v41  ;;  %s935_s19 = sshll.u32 %s416_s29, 4  ;;  %v907_v49 = vld [vmem:[%s1665_s18] sm:$0xf]  ;;  %s1098_s15 = sshll.u32 %s1530_s17, 6  ;;  %s1793_s19 = int_to_ptr.vmem [resolvable:$true] %s935_s19 }
  0x60   : > { %1106 = vmatpush3.msra.mxu0 %v1447_v0  ;;  %1166 = vmatpush3.msra.mxu1 %v1447_v0  ;;  %v730_v22 = vld [vmem:[%s1868_s5] sm:$0xf]  ;;  %s1784_s27 = scalar_lea.vmem [#allocation8], %s1083_s21  ;;  %s1798_s21 = scalar_lea.hbm %s1873_s10, %s1098_s15 }
  0x61   : > { %1107 = vmatprep.subr.mxu0 %v1447_v0  ;;  %1167 = vmatprep.subr.mxu1 %v1448_v1  ;;  %v812_v23 = vld [vmem:[%s1870_s7] sm:$0xf]  ;;  %v899_v44 = vunpack.c.0.s8 %v898_v42  ;;  %s948_s11 = sshll.u32 %s1784_s27, 4  ;;  %s916_s18 = scalar_lea.sflag [#allocation4], %s1649_s16  ;;  %s1800_s11 = int_to_ptr.vmem [resolvable:$true] %s948_s11 }
  0x62   : > { %1108 = vmatpush3.msra.mxu0 %v1447_v0  ;;  %1168 = vmatpush3.msra.mxu1 %v1447_v0  ;;  %v731_v25 = vld [vmem:[%s1869_s6] sm:$0xf]  ;;  %s1345_s30 = scalar_lea.vmem %s1793_s19, 128  ;;  %p1896_p3 = scmp.ne.s32.totalorder %s1887_s25, 0 }
  0x63   : > { %1109 = vmatprep.subr.mxu0 %v1447_v0  ;;  %1169 = vmatprep.subr.mxu1 %v1448_v1  ;;  %v813_v26 = vld [vmem:[%s1871_s8] sm:$0xf]  ;;  %v902_v46 = vsub.s32 %v899_v44, %v901_v45  ;;  %p1346_p13 = scmp.ne.s32.totalorder %s1793_s19, %s1345_s30  ;;  %s1452_s24 = smov [#allocation7]  }
  0x64   : > { %1110 = vmatpush3.msra.mxu0 %v1447_v0  ;;  %1170 = vmatpush3.msra.mxu1 %v1447_v0  ;;  %s1349_s28 = sshll.u32 %s1452_s24, 4  ;;  %s1350_s28 = int_to_ptr.vmem [resolvable:$false] %s1349_s28 }
  0x65   : > { %1111 = vmatprep.subr.mxu0 %v1447_v0  ;;  %1171 = vmatprep.subr.mxu1 %v1448_v1  ;;  %p1347_p7 = pnand %p1346_p13, %p1896_p3  ;;  %s1351_s22 = scalar_lea.vmem %s1350_s28, 256 }
  0x66   : > { %1112 = vmatpush3.msra.mxu0 %v1447_v0  ;;  %1172 = vmatpush3.msra.mxu1 %v1447_v0  ;;  %p1352_p10 = scmp.lt.s32.totalorder %s1793_s19, %s1350_s28  ;;  %p1353_p2 = scmp.lt.s32.totalorder %s1351_s22, %s1345_s30 }
  0x67   : > { %1113 = vmatprep.subr.mxu0 %v1447_v0  ;;  %1173 = vmatprep.subr.mxu1 %v1448_v1  ;;  %p1348_p8 = pneg %p1347_p7 }
  0x68   : > { %1114 = vmatpush3.msra.mxu0 %v1447_v0  ;;  %1174 = vmatpush3.msra.mxu1 %v1447_v0  ;;  %p1354_p4 = por %p1353_p2, %p1352_p10 }
  0x69   : > { %1115 = vmatprep.subr.mxu0 %v1447_v0  ;;  %1175 = vmatprep.subr.mxu1 %v1448_v1 }
  0x6a   : > { %1116 = vmatpush3.msra.mxu0 %v1447_v0  ;;  %1176 = vmatpush3.msra.mxu1 %v1447_v0  ;;  %p1355_p5 = pnand %p1354_p4, %p1348_p8 }
  0x6b   : > { %1117 = vmatprep.subr.mxu0 %v1447_v0  ;;  %1177 = vmatprep.subr.mxu1 %v1448_v1 }
  0x6c   : > { %1118 = vmatpush3.msra.mxu0 %v1447_v0  ;;  %1178 = vmatpush3.msra.mxu1 %v1447_v0 }
  0x6d   : > { %1119 = vmatprep.subr.mxu0 %v1447_v0  ;;  %1179 = vmatprep.subr.mxu1 %v1448_v1 }
  0x6e   : > { %1120 = vmatpush3.msra.mxu0 %v1447_v0  ;;  %1180 = vmatpush3.msra.mxu1 %v1447_v0 }
  0x6f   : > { %1121 = vmatprep.subr.mxu0 %v1447_v0  ;;  %1181 = vmatprep.subr.mxu1 %v1448_v1 }
  0x70   : > { %1122 = vmatpush3.msra.mxu0 %v1447_v0  ;;  %1182 = vmatpush3.msra.mxu1 %v1447_v0 }
  0x71   : > { %1123 = vmatprep.subr.mxu0 %v1447_v0  ;;  %1183 = vmatprep.subr.mxu1 %v1448_v1 }
  0x72   : > { %1124 = vmatpush3.msra.mxu0 %v1447_v0  ;;  %1184 = vmatpush3.msra.mxu1 %v1447_v0 }
  0x73   : > { %1125 = vmatprep.subr.mxu0 %v1447_v0  ;;  %1185 = vmatprep.subr.mxu1 %v1448_v1 }
  0x74   : > { %1126 = vmatpush3.msra.mxu0 %v1447_v0  ;;  %1186 = vmatpush3.msra.mxu1 %v1447_v0 }
  0x75   : > { %1127 = vmatprep.subr.mxu0 %v1447_v0  ;;  %1187 = vmatprep.subr.mxu1 %v1448_v1 }
  0x76   : > { %1128 = vmatpush3.msra.mxu0 %v1447_v0  ;;  %1188 = vmatpush3.msra.mxu1 %v1447_v0 }
  0x77   : > { %1129 = vmatprep.subr.mxu0 %v1447_v0  ;;  %1189 = vmatprep.subr.mxu1 %v1448_v1 }
  0x78   : > { %1130 = vmatpush3.msra.mxu0 %v1447_v0  ;;  %1190 = vmatpush3.msra.mxu1 %v1447_v0 }
  0x79   : > { %1131 = vmatprep.subr.mxu0 %v1447_v0  ;;  %1191 = vmatprep.subr.mxu1 %v1448_v1 }
  0x7a   : > { %1132 = vmatpush3.msra.mxu0 %v1447_v0  ;;  %493 = vmatprep.mubr.f32.mxu0 %v427_v3 }
  0x7b   : > { %1133 = vmatprep.subr.mxu0 %v1447_v0  ;;  %1192 = vmatpush3.msra.mxu1 %v1447_v0 }
  0x7c   : > { %1134 = vmatpush3.msra.mxu0 %v1447_v0  ;;  %1193 = vmatprep.subr.mxu1 %v1448_v1 }
  0x7d   : > { %494 = vmatmul.mubr.f32.vlgmr.msra.gmra.mxu0 %v1718_v2  ;;  %1194 = vmatpush3.msra.mxu1 %v1447_v0 }
  0x7e   : > { %1195 = vmatprep.mubr.msk.f32.mxu1 %vm1449_vm0, %v1448_v1  ;;  %1198 = vmatprep.subr.mxu0 %v1448_v1 }
  0x7f   : > { %1196 = vmatmul.mubr.f32.vlgmr.msra.gmra.mxu1 %v425_v4  ;;  %1200 = vmatprep.mubr.msk.f32.mxu0 %vm1449_vm0, %v1448_v1 }
  0x80   : > { %1203 = vmatprep.subr.mxu1 %v1448_v1  ;;  %1205 = vmatprep.mubr.msk.f32.mxu1 %vm1449_vm0, %v1448_v1 }
  0x81   : > { %1279 = vset.pattern.permute.xlu0 %v1450_v24 }
 0x13d   : > { %v1135_v5 = vpop.f32.mrf.mxu0 }
 0x13f   : > { %v1136_v6 = vpop.f32.mrf.mxu0  ;;  %v566_v7 = vpop.f32.mrf.mxu1 }
 0x140   : > { %v1137_v8 = vadd.f32 %v1136_v6, %v1135_v5  ;;  %v570_v9 = vmul.f32 0.0078125, %v566_v7 }
 0x141   : > { %v1197_v11 = vpop.f32.mrf.mxu1 }
 0x142   : > { %v499_v12 = vmul.f32 0.00390625, %v1137_v8  ;;  %1199 = vmatpush3.msk.msra.mxu0 %vm577_vm1, %v570_v9 }
 0x143   : > { %1201 = vmatmul.mubr.msk.f32.vlgmr.msra.gmra.mxu0 %vm573_vm2, %v572_v10  ;;  %1208 = vmatprep.subr.mxu0 %v1448_v1 }
 0x144   : > { %1204 = vmatpush3.msk.msra.mxu1 %vm577_vm1, %v499_v12  ;;  %1210 = vmatprep.mubr.msk.f32.mxu0 %vm1449_vm0, %v1448_v1 }
 0x145   : > { %1206 = vmatmul.mubr.msk.f32.vlgmr.msra.gmra.mxu1 %vm573_vm2, %v571_v13  ;;  %1213 = vmatprep.subr.mxu1 %v1448_v1 }
 0x146   : > { %1215 = vmatprep.mubr.msk.f32.mxu1 %vm1449_vm0, %v1448_v1 }
 0x203   : > { %v647_v14 = vpop.f32.mrf.mxu0 }
 0x205   : > { %v1202_v15 = vpop.f32.mrf.mxu0  ;;  %v723_v16 = vpop.f32.mrf.mxu1 }
 0x206   : > { %v724_v18 = vadd.f32 %v723_v16, %v647_v14 }
 0x207   : > { %v1207_v19 = vpop.f32.mrf.mxu1 }
 0x208   : > { %v728_v20 = vadd.f32 %v727_v17, %v724_v18 }
 0x20a   : > { %v729_v21 = vmax.f32 %v728_v20, 0.0 }
 0x20c   : > { %1209 = vmatpush3.msra.mxu0 %v729_v21  ;;  %1214 = vmatpush3.msra.mxu1 %v729_v21 }
 0x20d   : > { %1211 = vmatmul.mubr.msk.f32.vlgmr.msra.gmra.mxu0 %vm732_vm3, %v730_v22  ;;  %1216 = vmatmul.mubr.msk.f32.vlgmr.msra.gmra.mxu1 %vm732_vm3, %v812_v23 }
 0x2cd   : > { %v802_v27 = vpop.f32.mrf.mxu0  ;;  %v883_v28 = vpop.f32.mrf.mxu1 }
 0x2ce   : > { %v803_v29 = vadd.f32 %v802_v27, %v731_v25  ;;  %v884_v30 = vadd.f32 %v883_v28, %v813_v26 }
 0x2cf   : > { %v1212_v31 = vpop.f32.mrf.mxu0  ;;  %v1217_v32 = vpop.f32.mrf.mxu1 }
 0x2d0   : > { %v1091_v33 = vmul.f32 -1.442695, %v803_v29  ;;  %v1093_v34 = vmul.f32 -1.442695, %v884_v30 }
 0x2d2   : > { %1281 = vpow2.f32 %v1091_v33 }
 0x2d3   : > { %1283 = vpow2.f32 %v1093_v34 }
 0x2df   : > { %v1282_v35 = vpop.eup %1281 }
 0x2e0   : > { %v1284_v36 = vpop.eup %1283  ;;  %v809_v37 = vadd.f32 1.0, %v1282_v35 }
 0x2e1   : > { %v890_v38 = vadd.f32 1.0, %v1284_v36 }
 0x2e2   : > { %1285 = vrcp.f32 %v809_v37 }
 0x2e3   : > { %1287 = vrcp.f32 %v890_v38 }
 0x2ef   : > { %v1286_v39 = vpop.eup %1285 }
 0x2f0   : > { %895 = vperm.xlu0 %1279, %v1286_v39   ;;  %v1288_v40 = vpop.eup %1287 }
 0x2f4   : > { %910 = vperm.xlu0 %1279, %v1288_v40  }
 0x36b   : > { %v896_v47 = vpop.permute.xlu0 %895 }
 0x36c   : > { %v903_v48 = vrot.slane %v896_v47, %v902_v46 }
 0x36e   : > { %v905_v50 = vmul.f32 %v903_v48, %v1718_v2 }
 0x36f   : > { %v911_v51 = vpop.permute.xlu0 %910 }
 0x370   : > { %v913_v52 = vmul.f32 %v911_v51, %v907_v49  ;;  %906 = vst [vmem:[%s416_s29] sm:$0xff] %v905_v50 }
 0x371   : > { %1358 = shalt.err (!%p1355_p5)
}
 0x372   : > { %s1359_s29 = scalar_lea.hbm %s1791_s20, 128  ;;  %s1363_s12 = scalar_lea.hbm %s1872_s9, 256 }
 0x373   : > { %p1360_p9 = scmp.ne.s32.totalorder %s1791_s20, %s1359_s29  ;;  %p1364_p12 = scmp.lt.s32.totalorder %s1791_s20, %s1872_s9 }
 0x374   : > { %p1365_p1 = scmp.lt.s32.totalorder %s1363_s12, %s1359_s29 }
 0x375   : > { %p1361_p0 = pnand %p1360_p9, %p1896_p3 }
 0x376   : > { %p1366_p6 = por %p1365_p1, %p1364_p12 }
 0x377   : > { %p1362_p11 = pneg %p1361_p0 }
 0x379   : > { %p1367_p13 = pnand %p1366_p6, %p1362_p11 }
 0x37b   : > { %1370 = shalt.err (!%p1367_p13)
}
 0x37c   : > { %1222 = dma.vmem_to_hbm [thread:$0]  (%p1896_p3), %s1793_s19, 128, %s1791_s20, %s916_s18   ;;  %914 = vst [vmem:[%s1784_s27] sm:$0xf] %v913_v52 }
 0x37d   : > { %s921_s30 = scalar_lea.sflag [#allocation9], %s1649_s16  ;;  %s1371_s24 = scalar_lea.vmem %s1800_s11, 64 }
 0x37e   : > { %p1372_p7 = scmp.ne.s32.totalorder %s1800_s11, %s1371_s24  ;;  %s1453_s28 = smov [#allocation8]  }
 0x37f   : > { %s1375_s22 = sshll.u32 %s1453_s28, 4  ;;  %s1376_s22 = int_to_ptr.vmem [resolvable:$false] %s1375_s22 }
 0x380   : > { %p1373_p8 = pnand %p1372_p7, %p1896_p3  ;;  %s1377_s29 = scalar_lea.vmem %s1376_s22, 128 }
 0x381   : > { %p1378_p2 = scmp.lt.s32.totalorder %s1800_s11, %s1376_s22  ;;  %p1379_p4 = scmp.lt.s32.totalorder %s1377_s29, %s1371_s24 }
 0x382   : > { %p1374_p10 = pneg %p1373_p8 }
 0x383   : > { %p1380_p5 = por %p1379_p4, %p1378_p2 }
 0x385   : > { %p1381_p9 = pnand %p1380_p5, %p1374_p10 }
 0x387   : > { %1384 = shalt.err (!%p1381_p9)
}
 0x388   : > { %s1385_s19 = scalar_lea.hbm %s1798_s21, 64  ;;  %s1389_s20 = scalar_lea.hbm %s1873_s10, 128 }
 0x389   : > { %p1386_p0 = scmp.ne.s32.totalorder %s1798_s21, %s1385_s19  ;;  %p1390_p1 = scmp.lt.s32.totalorder %s1798_s21, %s1873_s10 }
 0x38a   : > { %p1391_p6 = scmp.lt.s32.totalorder %s1389_s20, %s1385_s19 }
 0x38b   : > { %p1387_p11 = pnand %p1386_p0, %p1896_p3 }
 0x38c   : > { %p1392_p13 = por %p1391_p6, %p1390_p1 }
 0x38d   : > { %p1388_p12 = pneg %p1387_p11 }
 0x38f   : > { %p1393_p7 = pnand %p1392_p13, %p1388_p12 }
 0x391   : > { %1396 = shalt.err (!%p1393_p7)
}
 0x392   : > { %1223 = dma.vmem_to_hbm [thread:$0]  (%p1896_p3), %s1800_s11, 64, %s1798_s21, %s921_s30  }
 0x393 PF: > { %s1897_s0 = sld [smem:[#allocation15_spill]]  ;;  %s960_s12 = sand.u32 1, %s1431_s13  }
 0x394   : > { %p1898_p8 = scmp.ne.s32.totalorder %s1888_s26, 0  ;;  %s961_s17 = scalar_lea.sflag [#allocation4], %s960_s12 }
 0x399   : > { %p1899_p10 = scmp.ge.s32.totalorder %s1897_s0, 2 }
 0x39b   : > { %p1234_p2 = pnand %p1899_p10, %p1898_p8 }
 0x39d   : > { %p1235_p4 = pneg %p1234_p2 }
 0x39f   : > { %1422 = dma.done.wait (%p1235_p4), %s961_s17, 128  }
 0x3a0   : > { %1424 = vsyncadd (%p1235_p4), %s961_s17, 4294967168  ;;  %s970_s23 = scalar_lea.sflag [#allocation9], %s960_s12 }
 0x3a1   : > { %1426 = dma.done.wait (%p1235_p4), %s970_s23, 64  }
 0x3a2   : > { %1428 = vsyncadd (%p1235_p4), %s970_s23, 4294967232  ;;  %s1900_s16 = sld [smem:[#allocation16_spill]]  ;;  %s1903_s13 = smov %s1435_s14 }
 0x3a3   : > { %s1901_s25 = sld [smem:[#allocation14_spill]] }
 0x3a4   : > { %s1902_s15 = sld [smem:[#allocation17_spill]] }
 0x3a8   : > { %p30_p3 = scmp.ge.s32.totalorder %s1900_s16, 4  }
 0x3a9   : > { %s1904_s14 = smov %s1901_s25 }
 0x3aa   :  { %32 = sbr.rel (!%p30_p3) target bundleno = 11 (0xb), region = 131 }
 0x3af   :  { %975 = vsyncpa [#allocation3], 1 }
 0x3b0   :  { %977 = vsyncpa [#allocation3 + $0x1], 1 }
 0x3b1   :  { %978 = vsyncpa [#allocation6], 1 }
 0x3b2   :  { %980 = vsyncpa [#allocation6 + $0x1], 1 }
 0x3b3   :  { %981 = vsyncpa [#allocation4], 1 }
 0x3b4   :  { %983 = vsyncpa [#allocation4 + $0x1], 1 }
 0x3b5   :  { %984 = vsyncpa [#allocation9], 1 }
 0x3b6   :  { %986 = vsyncpa [#allocation9 + $0x1], 1 }

</bundles_post_ra>
